<compile_context>
chip_gen: v7x
topology: tpu7x:2x2x1
jax: 0.10.0
libtpu: 0.0.40
codegen_flags: <defaults>
</compile_context>

<pallas_src>
import jax
import jax.numpy as jnp
from jax.experimental import pallas as pl
from jax.experimental.pallas import tpu as pltpu

CLASSES = 10


def _round_up(x, m):
    return (x + m - 1) // m * m


def _cdiv(a, b):
    return (a + b - 1) // b


# ----------------------------------------------------------------------------
# Pallas kernel: fused [z | onehot(c)] -> (Linear -> ReLU)* -> Linear -> Sigmoid
# ----------------------------------------------------------------------------
def _make_mlp_kernel(num_layers, conditional, latent_size, num_classes,
                     bias_offsets, padded_sizes, compute_dtype):

    def _sigmoid(x):
        # exp on the EUP + approximate reciprocal on the EUP: keeps the divide
        # off the VALU (error << bf16 weight quantization).
        return pl.reciprocal(1.0 + jnp.exp(-x), approx=True)

    def kernel(*refs):
        idx = 0
        x0_ref = refs[idx]; idx += 1                 # (tile_b, k0) compute_dtype
        if conditional:
            c_ref = refs[idx]; idx += 1              # (tile_b, 1) int32
        w0_ref = refs[idx]; idx += 1                 # (k0, pad0) merged layer-0 weight
        w_refs = [refs[idx + i] for i in range(num_layers - 1)]
        idx += num_layers - 1
        bias_ref = refs[idx]; idx += 1               # (1, sum(padded_sizes)) f32
        out_ref = refs[idx]

        tile_b, k0 = x0_ref.shape

        # ----- layer 0: one MXU dot over the fused [z | onehot] input ---------
        x0 = x0_ref[...]
        if conditional:
            labels = c_ref[...]                                        # (tile_b, 1)
            iota = jax.lax.broadcasted_iota(jnp.int32, (tile_b, k0), 1)
            onehot = (iota == labels + latent_size).astype(compute_dtype)
            x0 = x0 + onehot        # label columns of x0 are zero-padded by wrapper
        x = jnp.dot(x0, w0_ref[...], preferred_element_type=jnp.float32)
        x = x + bias_ref[:, bias_offsets[0]:bias_offsets[0] + padded_sizes[0]]
        x = jnp.maximum(x, 0.0) if num_layers > 1 else _sigmoid(x)

        # ----- remaining layers -----------------------------------------------
        for i in range(1, num_layers):
            x = jnp.dot(x.astype(compute_dtype), w_refs[i - 1][...],
                        preferred_element_type=jnp.float32)
            x = x + bias_ref[:, bias_offsets[i]:bias_offsets[i] + padded_sizes[i]]
            x = jnp.maximum(x, 0.0) if i + 1 < num_layers else _sigmoid(x)

        out_ref[...] = x.astype(out_ref.dtype)

    return kernel


# ----------------------------------------------------------------------------
# Decoder module (JAX wrapper mirroring the PyTorch semantics)
# ----------------------------------------------------------------------------
class Decoder:
    def __init__(self, layer_sizes, latent_size, reap, conditional, num_labels,
                 key=jax.random.PRNGKey(42), tile_b_max=256,
                 compute_dtype=jnp.bfloat16, out_dtype=jnp.float32):
        self.layer_sizes = list(layer_sizes)
        self.latent_size = latent_size
        self.reap = reap
        self.conditional = conditional
        self.num_labels = num_labels
        # bound tile_b so the live activation stays comfortably inside vregs
        self.tile_b_max = min(tile_b_max, 512)
        self.compute_dtype = compute_dtype
        self.out_dtype = out_dtype

        if conditional:
            assert num_labels == CLASSES, "module assumes num_labels == CLASSES"
            input_size = latent_size + reap * num_labels
        else:
            input_size = latent_size
        self.input_size = input_size

        # ---- master f32 parameters (nn.Linear-style: W (out,in), b (out,)) ----
        self.w_master, self.b_master = [], []
        in_sizes = [input_size] + self.layer_sizes[:-1]
        for in_size, out_size in zip(in_sizes, self.layer_sizes):
            key, kw, kb = jax.random.split(key, 3)
            bound = float(in_size) ** -0.5
            w = jax.random.uniform(kw, (out_size, in_size), jnp.float32, -bound, bound)
            b = jax.random.uniform(kb, (out_size,), jnp.float32, -bound, bound)
            self.w_master.append(w)
            self.b_master.append(b)

        # ---- kernel-ready operands (lane-dense, bf16 matmul weights) ----------
        # NOTE: 128 alignment matches the v5e MXU; for hidden widths >= 256 on
        # v6e/v7x a 256 alignment would use the full MXU column width.
        self.padded_sizes = [_round_up(s, 128) for s in self.layer_sizes]

        # layer 0: merged weight over the fused [z | onehot] input.  Label rows
        # are pre-summed over the `reap` repeated one-hot blocks so the kernel
        # needs exactly ONE dot for layer 0.
        w0_t = self.w_master[0].T                       # (input_size, out0)
        out0, pad0 = self.layer_sizes[0], self.padded_sizes[0]
        if conditional:
            self.k0 = latent_size + num_labels
            wc = jnp.zeros((num_labels, out0), jnp.float32)
            for r in range(reap):
                s = latent_size + r * num_labels
                wc = wc + w0_t[s:s + num_labels, :]
            w0 = jnp.concatenate([w0_t[:latent_size, :], wc], axis=0)
        else:
            self.k0 = latent_size
            w0 = w0_t
        self.w0 = jnp.pad(w0, ((0, 0), (0, pad0 - out0))).astype(compute_dtype)

        # layers 1..n-1: zero-pad K to padded_{i-1}, N to padded_i (exact)
        self.w_rest = []
        for i in range(1, len(self.layer_sizes)):
            wt = self.w_master[i].T                     # (in_i, out_i)
            in_i, out_i = wt.shape
            wt = jnp.pad(wt, ((0, self.padded_sizes[i - 1] - in_i),
                              (0, self.padded_sizes[i] - out_i)))
            self.w_rest.append(wt.astype(compute_dtype))

        # one concatenated, 128-aligned f32 bias row
        self.bias_offsets, chunks, off = [], [], 0
        for b, out_i, pad_i in zip(self.b_master, self.layer_sizes, self.padded_sizes):
            self.bias_offsets.append(off)
            chunks.append(jnp.pad(b, (0, pad_i - out_i)))
            off += pad_i
        self.bias_cat = jnp.concatenate(chunks).reshape(1, off).astype(jnp.float32)

    # -------- forward ---------------------------------------------------------
    def __call__(self, z, c=None):
        batch = z.shape[0]
        num_layers = len(self.layer_sizes)
        pad_last = self.padded_sizes[-1]

        # ---- tile selection: minimize batch padding; keep >= 2 grid steps so
        # both v7x TensorCores get work when the batch allows it.
        n_tiles = _cdiv(batch, self.tile_b_max)
        if n_tiles == 1 and batch > 8:
            n_tiles = 2
        tile_b = _round_up(_cdiv(batch, n_tiles), 8)
        padded_b = n_tiles * tile_b

        # ---- inputs: bf16 z, padded only when actually needed -----------------
        zb = z.astype(self.compute_dtype)
        row_pad = padded_b - batch
        col_pad = self.k0 - self.latent_size   # zero label columns filled in-kernel
        if row_pad or col_pad:
            zb = jnp.pad(zb, ((0, row_pad), (0, col_pad)))

        operands = [zb]
        in_specs = [pl.BlockSpec((tile_b, self.k0), lambda i: (i, 0))]

        if self.conditional:
            c2d = c.astype(jnp.int32).reshape(-1, 1)
            if row_pad:
                c2d = jnp.pad(c2d, ((0, row_pad), (0, 0)))
            operands.append(c2d)
            in_specs.append(pl.BlockSpec((tile_b, 1), lambda i: (i, 0)))

        def _const_spec(a):
            # constant block index -> stays VMEM-resident across grid steps
            return pl.BlockSpec(a.shape, lambda i: (0, 0))

        weight_ops = [self.w0] + self.w_rest + [self.bias_cat]
        for w in weight_ops:
            operands.append(w)
            in_specs.append(_const_spec(w))

        kernel = _make_mlp_kernel(num_layers, self.conditional, self.latent_size,
                                  CLASSES, tuple(self.bias_offsets),
                                  tuple(self.padded_sizes), self.compute_dtype)

        # ---- cost estimate + VMEM budget ---------------------------------------
        k_sizes = [self.k0] + self.padded_sizes[:-1]
        flops = 2 * padded_b * sum(k * n for k, n in zip(k_sizes, self.padded_sizes))
        out_itemsize = jnp.dtype(self.out_dtype).itemsize
        in_itemsize = jnp.dtype(self.compute_dtype).itemsize
        weight_bytes = sum(int(w.size) * w.dtype.itemsize for w in weight_ops)
        in_row_bytes = self.k0 * in_itemsize + (4 if self.conditional else 0)
        bytes_accessed = (padded_b * in_row_bytes + weight_bytes
                          + padded_b * pad_last * out_itemsize)
        cost = pl.CostEstimate(flops=int(flops),
                               transcendentals=int(2 * padded_b * pad_last),
                               bytes_accessed=int(bytes_accessed))

        # Weight/bias blocks are still double-buffered by default; budget for it.
        # TODO(synk): for very large layer_sizes add pipeline_mode=pl.Buffered(1)
        # on the constant-index weight specs to halve resident weight VMEM.
        in_tile_bytes = tile_b * in_row_bytes
        out_tile_bytes = tile_b * pad_last * out_itemsize
        vmem_need = 2 * (in_tile_bytes + weight_bytes + out_tile_bytes) + (4 << 20)
        vmem_limit = int(min(64 << 20, max(32 << 20, vmem_need)))

        out_padded = pl.pallas_call(
            kernel,
            grid=(n_tiles,),
            out_shape=jax.ShapeDtypeStruct((padded_b, pad_last), self.out_dtype),
            in_specs=in_specs,
            out_specs=pl.BlockSpec((tile_b, pad_last), lambda i: (i, 0)),
            compiler_params=pltpu.CompilerParams(
                dimension_semantics=("parallel",),
                vmem_limit_bytes=vmem_limit),
            cost_estimate=cost,
        )(*operands)

        # slice off padding only when it exists
        out = out_padded
        if row_pad:
            out = out[:batch]
        if pad_last != self.layer_sizes[-1]:
            out = out[:, :self.layer_sizes[-1]]
        return out


# ----------------------------------------------------------------------------
# Pure-JAX (f32) reference matching the PyTorch spec, for sanity checking
# ----------------------------------------------------------------------------
def reference_forward(dec: Decoder, z, c):
    x = z.astype(jnp.float32)
    if dec.conditional:
        c_onehot = jax.nn.one_hot(c, CLASSES, dtype=jnp.float32)
        for _ in range(dec.reap):
            x = jnp.concatenate((x, c_onehot), axis=-1)
    n = len(dec.layer_sizes)
    for i, (w, b) in enumerate(zip(dec.w_master, dec.b_master)):
        x = x @ w.T + b
        x = jnp.maximum(x, 0.0) if i + 1 < n else jax.nn.sigmoid(x)
    return x


# ----------------------------------------------------------------------------
if __name__ == "__main__":
    # latent_size=16, reap=2, num_labels=10 -> MLP input = 16 + 2*10 = 36
    # layer_sizes=[32, 64] -> Linear(36,32) + ReLU + Linear(32,64) + Sigmoid
    layer_sizes = [32, 64]
    latent_size = 16
    reap = 2
    conditional = True
    num_labels = CLASSES
    batch = 300          # -> 2 grid steps of 152 rows (only 4 padded rows)

    key = jax.random.PRNGKey(0)
    kz, kc = jax.random.split(key)
    z = jax.random.normal(kz, (batch, latent_size), dtype=jnp.float32)
    c = jax.random.randint(kc, (batch,), 0, CLASSES)

    dec = Decoder(layer_sizes, latent_size, reap, conditional, num_labels)

    out = jax.block_until_ready(dec(z, c))

    ref = reference_forward(dec, z, c)
    assert out.shape == (batch, layer_sizes[-1])
    # bf16 matmul operands + approx-reciprocal sigmoid vs f32 reference
    assert jnp.allclose(out, ref, atol=2e-2, rtol=0.0), "mismatch vs reference"

    print("KERNEL_OK")
</pallas_src>

<mosaic_0001>
module attributes {stable_mosaic.version = 11 : i64} {
  func.func @kernel(%arg0: i32, %arg1: memref<152x26xbf16, #tpu.memory_space<vmem>>, %arg2: memref<152x1xi32, #tpu.memory_space<vmem>>, %arg3: memref<26x128xbf16, #tpu.memory_space<vmem>>, %arg4: memref<128x128xbf16, #tpu.memory_space<vmem>>, %arg5: memref<1x256xf32, #tpu.memory_space<vmem>>, %arg6: memref<152x128xf32, #tpu.memory_space<vmem>>) attributes {dimension_semantics = [#tpu.dimension_semantics<parallel>], iteration_bounds = array<i64: 2>, scalar_prefetch = 0 : i64, scratch_operands = 0 : i64, tpu.core_type = #tpu.core_type<tc>, window_params = [{transform_indices = @transform_0, window_bounds = array<i64: 152, 26>}, {transform_indices = @transform_1, window_bounds = array<i64: 152, 1>}, {pipeline_mode = #tpu.pipeline_mode<synchronous>, transform_indices = @transform_2, window_bounds = array<i64: 26, 128>}, {pipeline_mode = #tpu.pipeline_mode<synchronous>, transform_indices = @transform_3, window_bounds = array<i64: 128, 128>}, {pipeline_mode = #tpu.pipeline_mode<synchronous>, transform_indices = @transform_4, window_bounds = array<i64: 1, 256>}, {transform_indices = @transform_5, window_bounds = array<i64: 152, 128>}]} {
    %c0 = arith.constant 0 : index
    %c0_0 = arith.constant 0 : index
    %0 = vector.load %arg1[%c0, %c0_0] : memref<152x26xbf16, #tpu.memory_space<vmem>>, vector<152x26xbf16>
    %c0_1 = arith.constant 0 : index
    %c0_2 = arith.constant 0 : index
    %1 = vector.load %arg2[%c0_1, %c0_2] : memref<152x1xi32, #tpu.memory_space<vmem>>, vector<152x1xi32>
    %2 = tpu.iota {dimensions = array<i32: 1>} : vector<152x26xi32>
    %c16_i32 = arith.constant 16 : i32
    %3 = vector.broadcast %c16_i32 : i32 to vector<152x1xi32>
    %4 = arith.addi %1, %3 : vector<152x1xi32>
    %5 = vector.broadcast %4 : vector<152x1xi32> to vector<152x26xi32>
    %6 = arith.cmpi eq, %2, %5 : vector<152x26xi32>
    %7 = arith.extui %6 : vector<152x26xi1> to vector<152x26xi32>
    %8 = arith.sitofp %7 : vector<152x26xi32> to vector<152x26xf32>
    %9 = arith.truncf %8 : vector<152x26xf32> to vector<152x26xbf16>
    %10 = arith.addf %0, %9 : vector<152x26xbf16>
    %c0_3 = arith.constant 0 : index
    %c0_4 = arith.constant 0 : index
    %11 = vector.load %arg3[%c0_3, %c0_4] : memref<26x128xbf16, #tpu.memory_space<vmem>>, vector<26x128xbf16>
    %cst = arith.constant dense<0.000000e+00> : vector<152x128xf32>
    %12 = tpu.matmul %10, %11, %cst {dimension_numbers = #tpu.dot_dimension_numbers<[1], [0], [0], [1], [0, 0, 1, 1], [], []>} : vector<152x26xbf16>, vector<26x128xbf16>, vector<152x128xf32> -> vector<152x128xf32>
    %c0_5 = arith.constant 0 : index
    %c0_6 = arith.constant 0 : index
    %13 = vector.load %arg5[%c0_5, %c0_6] : memref<1x256xf32, #tpu.memory_space<vmem>>, vector<1x128xf32>
    %14 = vector.broadcast %13 : vector<1x128xf32> to vector<152x128xf32>
    %15 = arith.addf %12, %14 : vector<152x128xf32>
    %cst_7 = arith.constant 0.000000e+00 : f32
    %16 = vector.broadcast %cst_7 : f32 to vector<152x128xf32>
    %17 = arith.maximumf %15, %16 : vector<152x128xf32>
    %18 = arith.truncf %17 : vector<152x128xf32> to vector<152x128xbf16>
    %c0_8 = arith.constant 0 : index
    %c0_9 = arith.constant 0 : index
    %19 = vector.load %arg4[%c0_8, %c0_9] : memref<128x128xbf16, #tpu.memory_space<vmem>>, vector<128x128xbf16>
    %cst_10 = arith.constant dense<0.000000e+00> : vector<152x128xf32>
    %20 = tpu.matmul %18, %19, %cst_10 {dimension_numbers = #tpu.dot_dimension_numbers<[1], [0], [0], [1], [0, 0, 1, 1], [], []>} : vector<152x128xbf16>, vector<128x128xbf16>, vector<152x128xf32> -> vector<152x128xf32>
    %c0_11 = arith.constant 0 : index
    %c128 = arith.constant 128 : index
    %21 = vector.load %arg5[%c0_11, %c128] : memref<1x256xf32, #tpu.memory_space<vmem>>, vector<1x128xf32>
    %22 = vector.broadcast %21 : vector<1x128xf32> to vector<152x128xf32>
    %23 = arith.addf %20, %22 : vector<152x128xf32>
    %cst_12 = arith.constant 0.000000e+00 : f32
    %24 = vector.broadcast %cst_12 : f32 to vector<152x128xf32>
    %25 = arith.subf %24, %23 : vector<152x128xf32>
    %26 = math.exp %25 : vector<152x128xf32>
    %cst_13 = arith.constant 1.000000e+00 : f32
    %27 = vector.broadcast %cst_13 : f32 to vector<152x128xf32>
    %28 = arith.addf %27, %26 : vector<152x128xf32>
    %29 = tpu.reciprocal %28 {approx = true} : vector<152x128xf32> -> vector<152x128xf32>
    %c0_14 = arith.constant 0 : index
    %c0_15 = arith.constant 0 : index
    %30 = vector.load %arg6[%c0_14, %c0_15] : memref<152x128xf32, #tpu.memory_space<vmem>>, vector<152x128xf32>
    tpu.vector_store %arg6[%c0_14, %c0_15], %29 {strides = array<i32>} : memref<152x128xf32, #tpu.memory_space<vmem>>, vector<152x128xf32>,
    return
  }
  func.func @transform_0(%arg0: i32) -> (i32, i32) {
    %c0_i32 = arith.constant 0 : i32
    %c0_i32_0 = arith.constant 0 : i32
    return %arg0, %c0_i32 : i32, i32
  }
  func.func @transform_1(%arg0: i32) -> (i32, i32) {
    %c0_i32 = arith.constant 0 : i32
    %c0_i32_0 = arith.constant 0 : i32
    return %arg0, %c0_i32 : i32, i32
  }
  func.func @transform_2(%arg0: i32) -> (i32, i32) {
    %c0_i32 = arith.constant 0 : i32
    %c0_i32_0 = arith.constant 0 : i32
    %c0_i32_1 = arith.constant 0 : i32
    return %c0_i32, %c0_i32_0 : i32, i32
  }
  func.func @transform_3(%arg0: i32) -> (i32, i32) {
    %c0_i32 = arith.constant 0 : i32
    %c0_i32_0 = arith.constant 0 : i32
    %c0_i32_1 = arith.constant 0 : i32
    return %c0_i32, %c0_i32_0 : i32, i32
  }
  func.func @transform_4(%arg0: i32) -> (i32, i32) {
    %c0_i32 = arith.constant 0 : i32
    %c0_i32_0 = arith.constant 0 : i32
    %c0_i32_1 = arith.constant 0 : i32
    return %c0_i32, %c0_i32_0 : i32, i32
  }
  func.func @transform_5(%arg0: i32) -> (i32, i32) {
    %c0_i32 = arith.constant 0 : i32
    %c0_i32_0 = arith.constant 0 : i32
    return %arg0, %c0_i32 : i32, i32
  }
}

</mosaic_0001>

<bundles_post_ra>
// kernel: tpu_custom_call.1
= control target key start
LH: loop header
LB: loop body
LE: loop exit
PB: predicated region body
PF: predicated region fallthrough
CT: control target
= control target key end

     0   :  { %10 = vsyncpa [#allocation3], 0  ;;  %s1930_s0 = inlined_call_operand.vmem [shape: bf16[304,26], index: 0, kind: input, shape index: {}]   ;;  %s1931_s1 = inlined_call_operand.vmem [shape: s32[304,1], index: 1, kind: input, shape index: {}]   ;;  %s1932_s2 = inlined_call_operand.vmem [shape: bf16[26,128], index: 2, kind: input, shape index: {}]   ;;  %s1933_s3 = inlined_call_operand.vmem [shape: bf16[128,128], index: 3, kind: input, shape index: {}]   ;;  %s1934_s4 = inlined_call_operand.vmem [shape: f32[1,256], index: 4, kind: input, shape index: {}]   ;;  %s1935_s5 = inlined_call_operand.hbm [shape: f32[304,128], index: 5, kind: output, shape index: {}]  }
   0x1   :  { %12 = vsyncpa [#allocation3 + $0x1], 0  ;;  %s1586_s18 = smov 0   ;;  %s1588_s19 = smov 0  }
   0x2   :  { %s1590_s20 = smov 0   ;;  %s1592_s21 = smov 0  }
   0x3 LB: > { %s1607_s22 = sadd.s32 4294967295, %s1549_s21   ;;  %s1149_s23 = sadd.s32 4294967294, %s1549_s21   ;;  %s1549_s21 = sphi %s1592_s21, %s1941_s21   ;;  %s1545_s20 = sphi %s1590_s20, %s1940_s20   ;;  %s1541_s19 = sphi %s1588_s19, %s1939_s19   ;;  %s1537_s18 = sphi %s1586_s18, %s1938_s18  }
   0x4   : > { %s1611_s24 = sadd.s32 1, %s1549_s21   ;;  %s140_s25 = sadd.s32 1, %s1545_s20 }
   0x5   : > { %s137_s26 = ssub.s32 %s1549_s21, %s1611_s24  ;;  %p150_p0 = scmp.ne.s32.totalorder %s1545_s20, %s1541_s19 }
   0x6   : > { %p138_p1 = scmp.eq.s32.totalorder %s137_s26, 0  ;;  %p151_p2 = scmp.eq.s32.totalorder %s1607_s22, 1 }
   0x7   : > { %p156_p3 = scmp.ne.s32.totalorder %s1541_s19, %s1537_s18  ;;  %p157_p4 = scmp.eq.s32.totalorder %s1149_s23, 1 }
   0x8   : > { %s1622_s27 = scalar_select %p138_p1, %s1545_s20, %s140_s25  }
   0x9   : > { %p1624_p5 = por %p151_p2, %p150_p0  ;;  %p1628_p6 = por %p157_p4, %p156_p3 }
   0xa   : > { %p1152_p7 = scmp.ge.s32.totalorder %s1549_s21, 1  ;;  %p202_p8 = scmp.lt.s32.totalorder %s1549_s21, 3 }
   0xc   : > { %p203_p9 = pnand %p1152_p7, %p202_p8 }
   0xd   : > { %s235_s30 = smul.u32 (!%p203_p9), 19, %s1607_s22  ;;  %v1551_v0 = vmov (!%p203_p9), 0   ;;  %v1401_v11 = vld [vmem:[%s1932_s2] sm:$0xff] (!%p203_p9)   ;;  %v1402_v16 = vld [vmem:[%s1932_s2 + $0x8] sm:$0x1f] (!%p203_p9)   ;;  %vm619_vm0 = vcmask (!%p203_p9), 1044480   ;;  %v287_v48 = vlaneseq (!%p203_p9) }
   0xe   : > { %206 = sbr.rel (%p203_p9) target bundleno = 683 (0x2ab), region = 40  ;;  %1400 = vset.pattern.permute.xlu1 (!%p203_p9), %v1551_v0  ;;  %1399 = vset.pattern.permute.xlu0 (!%p203_p9), %v1551_v0  ;;  %v621_v21 = vsel (!%p203_p9), %vm619_vm0, %v1402_v16, 0  ;;  %v1671_v42 = vld [vmem:[%s1933_s3] sm:$0xff] (!%p203_p9)   ;;  %v1677_v43 = vld [vmem:[%s1933_s3 + $0x8] sm:$0xff] (!%p203_p9)   ;;  %v1685_v44 = vld [vmem:[%s1933_s3 + $0x10] sm:$0xff] (!%p203_p9)   ;;  %v1552_v52 = vmov (!%p203_p9), 0.0  }
   0xf   : > { %p236_p10 = scmp.lt.s32.totalorder (!%p203_p9), %s235_s30, 37  ;;  %1278 = vmatprep.subr.bf16.mxu0 (!%p203_p9), %v1401_v11  ;;  %1338 = vmatprep.subr.bf16.mxu1 (!%p203_p9), %v1671_v42  ;;  %v1692_v45 = vld [vmem:[%s1933_s3 + $0x18] sm:$0xff] (!%p203_p9)   ;;  %v1699_v46 = vld [vmem:[%s1933_s3 + $0x20] sm:$0xff] (!%p203_p9)   ;;  %v1706_v47 = vld [vmem:[%s1933_s3 + $0x28] sm:$0xff] (!%p203_p9)   ;;  %v1711_v49 = vand.u32 (!%p203_p9), 127, %v287_v48  ;;  %vm588_vm7 = vcmask (!%p203_p9), 211968  }
  0x10   : > { %1279 = vmatpush3.bf16.msra.mxu0 (!%p203_p9), %v1401_v11  ;;  %1346 = vmatpush3.bf16.msra.mxu1 (!%p203_p9), %v1671_v42  ;;  %s232_s7 = sand.u32 (!%p203_p9), 1, %s1541_s19   ;;  %s1247_s10 = smul.u32 (!%p203_p9), 2432, %s1607_s22 }
  0x11   : > { %1354 = vmatprep.subr.msk.bf16.mxu0 (!%p203_p9), %vm619_vm0, %v1402_v16  ;;  %1339 = vmatprep.subr.bf16.mxu1 (!%p203_p9), %v1677_v43  ;;  %s1847_s8 = smul.u32 (!%p203_p9), 152, %s232_s7  ;;  %s1553_s15 = smov (!%p203_p9), [#allocation2]  }
  0x12   : > { %s1491_s16 = sshll.u32 (!%p203_p9), %s1553_s15, 4  ;;  %s1492_s16 = int_to_ptr.vmem [resolvable:$false] %s1491_s16 }
  0x13   : > { %s1493_s17 = scalar_lea.vmem (!%p203_p9), %s1492_s16, 4864 }
  0x14   : > { %1281 = vmatpush3.bf16.msra.mxu0 (!%p203_p9), %v621_v21  ;;  %1347 = vmatpush3.bf16.msra.mxu1 (!%p203_p9), %v1677_v43 }
  0x15   : > { %s1943_s30 = smov (!%p236_p10, %s235_s30), 37  ;;  %1302 = vmatprep.subr.bf16.mxu0 %v1671_v42  ;;  %1340 = vmatprep.subr.bf16.mxu1 %v1685_v44 }
  0x16   : > { %s1154_s6 = sshll.u32 %s1943_s30, 3  ;;  %s1153_s11 = sshll.u32 %s1943_s30, 2 }
  0x17   : > { %s1641_s9 = scalar_lea.vmem %s1931_s1, %s1154_s6  ;;  %s1719_s14 = scalar_lea.vmem %s1930_s0, %s1153_s11 }
  0x18   : > { %v270_v1 = vld [vmem:[%s1641_s9 + $0x10] sm:$0xff]  ;;  %v268_v2 = vld [vmem:[%s1641_s9] sm:$0xff]  ;;  %v271_v3 = vld [vmem:[%s1641_s9 + $0x18] sm:$0xff]  ;;  %1348 = vmatpush3.bf16.msra.mxu1 %v1685_v44  ;;  %s1889_s30 = scalar_lea.sflag [#allocation3], %s232_s7 }
  0x19   : > { %v291_v4 = vadd.s32 16, %v270_v1  ;;  %v289_v5 = vadd.s32 16, %v268_v2  ;;  %v269_v6 = vld [vmem:[%s1641_s9 + $0x8] sm:$0xff]  ;;  %v292_v7 = vadd.s32 16, %v271_v3  ;;  %v272_v10 = vld [vmem:[%s1641_s9 + $0x20] sm:$0xff]  ;;  %v275_v14 = vld [vmem:[%s1641_s9 + $0x38] sm:$0xff]  ;;  %1341 = vmatprep.subr.bf16.mxu1 %v1692_v45 }
  0x1a   : > { %v290_v8 = vadd.s32 16, %v269_v6  ;;  %v273_v9 = vld [vmem:[%s1641_s9 + $0x28] sm:$0xff]  ;;  %v293_v13 = vadd.s32 16, %v272_v10  ;;  %v274_v15 = vld [vmem:[%s1641_s9 + $0x30] sm:$0xff]  ;;  %v296_v17 = vadd.s32 16, %v275_v14  ;;  %v276_v20 = vld [vmem:[%s1641_s9 + $0x40] sm:$0xff] }
  0x1b   : > { %315 = vperm.xlu1 %1400, %v291_v4   ;;  %309 = vperm.xlu0 %1399, %v289_v5   ;;  %v294_v12 = vadd.s32 16, %v273_v9  ;;  %v295_v18 = vadd.s32 16, %v274_v15  ;;  %v277_v19 = vld [vmem:[%s1641_s9 + $0x48] sm:$0xff]  ;;  %v297_v23 = vadd.s32 16, %v276_v20  ;;  %v279_v24 = vld [vmem:[%s1641_s9 + $0x58] sm:$0xff]  ;;  %v278_v25 = vld [vmem:[%s1641_s9 + $0x50] sm:$0xff] }
  0x1c   : > { %v298_v22 = vadd.s32 16, %v277_v19  ;;  %v300_v26 = vadd.s32 16, %v279_v24  ;;  %v299_v27 = vadd.s32 16, %v278_v25  ;;  %v281_v28 = vld [vmem:[%s1641_s9 + $0x68] sm:$0xff]  ;;  %v280_v29 = vld [vmem:[%s1641_s9 + $0x60] sm:$0xff]  ;;  %v283_v32 = vld [vmem:[%s1641_s9 + $0x78] sm:$0xff]  ;;  %1349 = vmatpush3.bf16.msra.mxu1 %v1692_v45 }
  0x1d   : > { %v302_v30 = vadd.s32 16, %v281_v28  ;;  %v301_v31 = vadd.s32 16, %v280_v29  ;;  %v282_v33 = vld [vmem:[%s1641_s9 + $0x70] sm:$0xff]  ;;  %v304_v34 = vadd.s32 16, %v283_v32  ;;  %v285_v36 = vld [vmem:[%s1641_s9 + $0x88] sm:$0xff]  ;;  %v284_v37 = vld [vmem:[%s1641_s9 + $0x80] sm:$0xff]  ;;  %1342 = vmatprep.subr.bf16.mxu1 %v1699_v46 }
  0x1e   : > { %v303_v35 = vadd.s32 16, %v282_v33  ;;  %v306_v38 = vadd.s32 16, %v285_v36  ;;  %v305_v39 = vadd.s32 16, %v284_v37  ;;  %v286_v40 = vld [vmem:[%s1641_s9 + $0x90] sm:$0xff]  ;;  %v251_v59 = vld [vmem:[%s1719_s14 + $0x8] sm:$0xf] }
  0x1f   : > { %318 = vperm.xlu1 %1400, %v292_v7   ;;  %312 = vperm.xlu0 %1399, %v290_v8   ;;  %v307_v41 = vadd.s32 16, %v286_v40  ;;  %v249_v60 = vld [vmem:[%s1719_s14] sm:$0xf]  ;;  %v252_v61 = vld [vmem:[%s1719_s14 + $0xc] sm:$0xf]  ;;  %s1854_s9 = scalar_lea.vmem [#allocation2], %s1847_s8 }
  0x20   : > { %1350 = vmatpush3.bf16.msra.mxu1 %v1699_v46  ;;  %v250_v0 = vld [vmem:[%s1719_s14 + $0x4] sm:$0xf]  ;;  %v254_v8 = vld [vmem:[%s1719_s14 + $0x14] sm:$0xf]  ;;  %v253_v11 = vld [vmem:[%s1719_s14 + $0x10] sm:$0xf] }
  0x21   : > { %1343 = vmatprep.subr.bf16.mxu1 %v1706_v47  ;;  %v256_v21 = vld [vmem:[%s1719_s14 + $0x1c] sm:$0xf]  ;;  %v258_v32 = vld [vmem:[%s1719_s14 + $0x24] sm:$0xf]  ;;  %v260_v48 = vld [vmem:[%s1719_s14 + $0x2c] sm:$0xf] }
  0x22   : > { %s1075_s11 = sshll.u32 %s1854_s9, 4  ;;  %s1883_s11 = int_to_ptr.vmem [resolvable:$true] %s1075_s11 }
  0x23   : > { %324 = vperm.xlu1 %1400, %v294_v12   ;;  %321 = vperm.xlu0 %1399, %v293_v13   ;;  %s1487_s22 = scalar_lea.vmem %s1883_s11, 2432  ;;  %p1494_p0 = scmp.lt.s32.totalorder %s1883_s11, %s1492_s16 }
  0x24   : > { %1351 = vmatpush3.bf16.msra.mxu1 %v1706_v47  ;;  %p1488_p11 = scmp.ne.s32.totalorder %s1883_s11, %s1487_s22  ;;  %p1495_p1 = scmp.lt.s32.totalorder %s1493_s17, %s1487_s22 }
  0x26   : > { %p1489_p12 = pnand %p1488_p11, %p1624_p5  ;;  %p1496_p2 = por %p1495_p1, %p1494_p0 }
  0x27   : > { %330 = vperm.xlu1 %1400, %v296_v17   ;;  %327 = vperm.xlu0 %1399, %v295_v18  }
  0x28   : > { %p1490_p13 = pneg %p1489_p12 }
  0x2a   : > { %p1497_p3 = pnand %p1496_p2, %p1490_p13 }
  0x2b   : > { %336 = vperm.xlu1 %1400, %v298_v22   ;;  %333 = vperm.xlu0 %1399, %v297_v23   ;;  %v255_v23 = vld [vmem:[%s1719_s14 + $0x18] sm:$0xf] }
  0x2f   : > { %342 = vperm.xlu1 %1400, %v300_v26   ;;  %339 = vperm.xlu0 %1399, %v299_v27  }
  0x33   : > { %348 = vperm.xlu1 %1400, %v302_v30   ;;  %345 = vperm.xlu0 %1399, %v301_v31  }
  0x37   : > { %354 = vperm.xlu1 %1400, %v304_v34   ;;  %351 = vperm.xlu0 %1399, %v303_v35   ;;  %v257_v34 = vld [vmem:[%s1719_s14 + $0x20] sm:$0xf] }
  0x3b   : > { %360 = vperm.xlu1 %1400, %v306_v38   ;;  %357 = vperm.xlu0 %1399, %v305_v39  }
  0x3f   : > { %363 = vperm.xlu0 %1399, %v307_v41  }
  0x9a   : > { %v316_v50 = vpop.permute.xlu1 %315  ;;  %v310_v51 = vpop.permute.xlu0 %309 }
  0x9b   : > { %vm367_vm1 = vcmp.eq.s32.totalorder %v1711_v49, %v316_v50  ;;  %vm365_vm2 = vcmp.eq.s32.totalorder %v1711_v49, %v310_v51  ;;  %v259_v51 = vld [vmem:[%s1719_s14 + $0x28] sm:$0xf] }
  0x9c   : > { %v1157_v53 = vsel %vm367_vm1, 1.0, %v1552_v52  ;;  %v1155_v54 = vsel %vm365_vm2, 1.0, %v1552_v52 }
  0x9d   : > { %v1230_v55 = vpack.c.bf16 %v1157_v53, %v1157_v53  ;;  %v1228_v56 = vpack.c.bf16 %v1155_v54, %v1155_v54 }
  0x9e   : > { %v319_v57 = vpop.permute.xlu1 %318  ;;  %v313_v58 = vpop.permute.xlu0 %312 }
  0x9f   : > { %vm368_vm3 = vcmp.eq.s32.totalorder %v1711_v49, %v319_v57  ;;  %vm366_vm4 = vcmp.eq.s32.totalorder %v1711_v49, %v313_v58  ;;  %v501_v3 = vadd.bf16 %v1230_v55, %v251_v59  ;;  %v499_v6 = vadd.bf16 %v1228_v56, %v249_v60  ;;  %v262_v60 = vld [vmem:[%s1719_s14 + $0x34] sm:$0xf] }
  0xa0   : > { %v1158_v62 = vsel %vm368_vm3, 1.0, %v1552_v52  ;;  %v1156_v63 = vsel %vm366_vm4, 1.0, %v1552_v52 }
  0xa1   : > { %v1231_v1 = vpack.c.bf16 %v1158_v62, %v1158_v62  ;;  %v1229_v2 = vpack.c.bf16 %v1156_v63, %v1156_v63  ;;  %v261_v62 = vld [vmem:[%s1719_s14 + $0x30] sm:$0xf] }
  0xa2   : > { %v325_v4 = vpop.permute.xlu1 %324  ;;  %v322_v5 = vpop.permute.xlu0 %321 }
  0xa3   : > { %v502_v7 = vadd.bf16 %v1231_v1, %v252_v61  ;;  %vm370_vm5 = vcmp.eq.s32.totalorder %v1711_v49, %v325_v4  ;;  %vm369_vm6 = vcmp.eq.s32.totalorder %v1711_v49, %v322_v5  ;;  %v500_v9 = vadd.bf16 %v1229_v2, %v250_v0 }
  0xa4   : > { %v1160_v10 = vsel %vm370_vm5, 1.0, %v1552_v52  ;;  %v1159_v12 = vsel %vm369_vm6, 1.0, %v1552_v52 }
  0xa5   : > { %v1195_v13 = vcombine.low %v501_v3, %v502_v7  ;;  %v1233_v14 = vpack.c.bf16 %v1160_v10, %v1160_v10  ;;  %v1232_v15 = vpack.c.bf16 %v1159_v12, %v1159_v12  ;;  %v1194_v16 = vcombine.low %v499_v6, %v500_v9  ;;  %v264_v6 = vld [vmem:[%s1719_s14 + $0x3c] sm:$0xf] }
  0xa6   : > { %v331_v17 = vpop.permute.xlu1 %330  ;;  %v328_v18 = vpop.permute.xlu0 %327 }
  0xa7   : > { %v504_v19 = vadd.bf16 %v1233_v14, %v254_v8  ;;  %v503_v20 = vadd.bf16 %v1232_v15, %v253_v11  ;;  %vm372_vm8 = vcmp.eq.s32.totalorder %v1711_v49, %v331_v17  ;;  %vm371_vm9 = vcmp.eq.s32.totalorder %v1711_v49, %v328_v18  ;;  %1282 = vmatprep.mubr.msk.bf16.mxu0 %vm588_vm7, %v1194_v16  ;;  %v263_v8 = vld [vmem:[%s1719_s14 + $0x38] sm:$0xf]  ;;  %v266_v16 = vld [vmem:[%s1719_s14 + $0x44] sm:$0xf]  ;;  %v265_v18 = vld [vmem:[%s1719_s14 + $0x40] sm:$0xf] }
  0xa8   : > { %v1162_v22 = vsel %vm372_vm8, 1.0, %v1552_v52  ;;  %v1161_v24 = vsel %vm371_vm9, 1.0, %v1552_v52  ;;  %1283 = vmatmul.mubr.msk.bf16.vlgmr.msra.gmra.mrb[0].mxu0 %vm588_vm7, %v1195_v13 }
  0xa9   : > { %v1196_v25 = vcombine.low %v503_v20, %v504_v19  ;;  %v1235_v26 = vpack.c.bf16 %v1162_v22, %v1162_v22  ;;  %v1234_v27 = vpack.c.bf16 %v1161_v24, %v1161_v24  ;;  %1303 = vmatpush3.bf16.msra.mxu0 %v1671_v42 }
  0xaa   : > { %v337_v28 = vpop.permute.xlu1 %336  ;;  %v334_v29 = vpop.permute.xlu0 %333  ;;  %1304 = vmatprep.subr.bf16.mxu0 %v1677_v43 }
  0xab   : > { %v506_v30 = vadd.bf16 %v1235_v26, %v256_v21  ;;  %v505_v31 = vadd.bf16 %v1234_v27, %v255_v23  ;;  %vm374_vm10 = vcmp.eq.s32.totalorder %v1711_v49, %v337_v28  ;;  %vm373_vm11 = vcmp.eq.s32.totalorder %v1711_v49, %v334_v29  ;;  %1286 = vmatprep.mubr.msk.bf16.mxu0 %vm588_vm7, %v1196_v25  ;;  %v267_v25 = vld [vmem:[%s1719_s14 + $0x48] sm:$0xf]  ;;  %s1880_s14 = scalar_lea.hbm %s1935_s5, %s1247_s10 }
  0xac   : > { %v1164_v33 = vsel %vm374_vm10, 1.0, %v1552_v52  ;;  %v1163_v35 = vsel %vm373_vm11, 1.0, %v1552_v52 }
  0xad   : > { %v1197_v36 = vcombine.low %v505_v31, %v506_v30  ;;  %v1237_v37 = vpack.c.bf16 %v1164_v33, %v1164_v33  ;;  %v1236_v38 = vpack.c.bf16 %v1163_v35, %v1163_v35  ;;  %1305 = vmatpush3.bf16.msra.mxu0 %v1677_v43 }
  0xae   : > { %v343_v39 = vpop.permute.xlu1 %342  ;;  %v340_v40 = vpop.permute.xlu0 %339  ;;  %1306 = vmatprep.subr.bf16.mxu0 %v1685_v44 }
  0xaf   : > { %v508_v41 = vadd.bf16 %v1237_v37, %v258_v32  ;;  %v507_v42 = vadd.bf16 %v1236_v38, %v257_v34  ;;  %vm376_vm12 = vcmp.eq.s32.totalorder %v1711_v49, %v343_v39  ;;  %vm375_vm13 = vcmp.eq.s32.totalorder %v1711_v49, %v340_v40 }
  0xb0   : > { %v1166_v50 = vsel %vm376_vm12, 1.0, %v1552_v52  ;;  %v1165_v53 = vsel %vm375_vm13, 1.0, %v1552_v52  ;;  %1287 = vmatmul.mubr.msk.bf16.gmra.mrb[4].mxu0 %vm588_vm7, %v1197_v36 }
  0xb1   : > { %v1198_v43 = vcombine.low %v507_v42, %v508_v41  ;;  %v1239_v54 = vpack.c.bf16 %v1166_v50, %v1166_v50  ;;  %v1238_v55 = vpack.c.bf16 %v1165_v53, %v1165_v53  ;;  %1307 = vmatpush3.bf16.msra.mxu0 %v1685_v44 }
  0xb2   : > { %v349_v56 = vpop.permute.xlu1 %348  ;;  %v346_v57 = vpop.permute.xlu0 %345  ;;  %1308 = vmatprep.subr.bf16.mxu0 %v1692_v45 }
  0xb3   : > { %v510_v58 = vadd.bf16 %v1239_v54, %v260_v48  ;;  %v509_v59 = vadd.bf16 %v1238_v55, %v259_v51  ;;  %vm378_vm14 = vcmp.eq.s32.totalorder %v1711_v49, %v349_v56  ;;  %vm377_vm15 = vcmp.eq.s32.totalorder %v1711_v49, %v346_v57  ;;  %1290 = vmatprep.mubr.msk.bf16.mxu0 %vm588_vm7, %v1198_v43 }
  0xb4   : > { %v1168_v61 = vsel %vm378_vm14, 1.0, %v1552_v52  ;;  %v1167_v44 = vsel %vm377_vm15, 1.0, %v1552_v52 }
  0xb5   : > { %v1199_v63 = vcombine.low %v509_v59, %v510_v58  ;;  %v1241_v0 = vpack.c.bf16 %v1168_v61, %v1168_v61  ;;  %v1240_v1 = vpack.c.bf16 %v1167_v44, %v1167_v44  ;;  %1309 = vmatpush3.bf16.msra.mxu0 %v1692_v45 }
  0xb6   : > { %v355_v2 = vpop.permute.xlu1 %354  ;;  %v352_v3 = vpop.permute.xlu0 %351  ;;  %1310 = vmatprep.subr.bf16.mxu0 %v1699_v46 }
  0xb7   : > { %v512_v4 = vadd.bf16 %v1241_v0, %v262_v60  ;;  %v511_v5 = vadd.bf16 %v1240_v1, %v261_v62  ;;  %vm380_vm0 = vcmp.eq.s32.totalorder %v1711_v49, %v355_v2  ;;  %vm379_vm1 = vcmp.eq.s32.totalorder %v1711_v49, %v352_v3 }
  0xb8   : > { %v1170_v7 = vsel %vm380_vm0, 1.0, %v1552_v52  ;;  %v1169_v9 = vsel %vm379_vm1, 1.0, %v1552_v52  ;;  %1291 = vmatmul.mubr.msk.bf16.gmra.mrb[8].mxu0 %vm588_vm7, %v1199_v63 }
  0xb9   : > { %v1200_v45 = vcombine.low %v511_v5, %v512_v4  ;;  %v1243_v10 = vpack.c.bf16 %v1170_v7, %v1170_v7  ;;  %v1242_v11 = vpack.c.bf16 %v1169_v9, %v1169_v9  ;;  %1311 = vmatpush3.bf16.msra.mxu0 %v1699_v46 }
  0xba   : > { %v361_v12 = vpop.permute.xlu1 %360  ;;  %v358_v13 = vpop.permute.xlu0 %357  ;;  %1312 = vmatprep.subr.bf16.mxu0 %v1706_v47 }
  0xbb   : > { %v514_v14 = vadd.bf16 %v1243_v10, %v264_v6  ;;  %v513_v15 = vadd.bf16 %v1242_v11, %v263_v8  ;;  %vm382_vm2 = vcmp.eq.s32.totalorder %v1711_v49, %v361_v12  ;;  %vm381_vm3 = vcmp.eq.s32.totalorder %v1711_v49, %v358_v13  ;;  %1294 = vmatprep.mubr.msk.bf16.mxu0 %vm588_vm7, %v1200_v45 }
  0xbc   : > { %v1172_v17 = vsel %vm382_vm2, 1.0, %v1552_v52  ;;  %v1171_v19 = vsel %vm381_vm3, 1.0, %v1552_v52 }
  0xbd   : > { %v1201_v46 = vcombine.low %v513_v15, %v514_v14  ;;  %v1245_v20 = vpack.c.bf16 %v1172_v17, %v1172_v17  ;;  %v1244_v21 = vpack.c.bf16 %v1171_v19, %v1171_v19  ;;  %1313 = vmatpush3.bf16.msra.mxu0 %v1706_v47  ;;  %v1409_v47 = vld [vmem:[%s1933_s3 + $0x30] sm:$0xff]  }
  0xbe   : > { %v364_v22 = vpop.permute.xlu0 %363  ;;  %1314 = vmatprep.subr.bf16.mxu0 %v1409_v47  ;;  %1344 = vmatprep.subr.bf16.mxu1 %v1409_v47 }
  0xbf   : > { %v516_v23 = vadd.bf16 %v1245_v20, %v266_v16  ;;  %v515_v24 = vadd.bf16 %v1244_v21, %v265_v18  ;;  %vm383_vm4 = vcmp.eq.s32.totalorder %v1711_v49, %v364_v22  ;;  %1352 = vmatpush3.bf16.msra.mxu1 %v1409_v47  ;;  %v1410_v49 = vld [vmem:[%s1933_s3 + $0x38] sm:$0xff]  }
  0xc0   : > { %v1173_v26 = vsel %vm383_vm4, 1.0, %v1552_v52  ;;  %1295 = vmatmul.mubr.msk.bf16.gmra.mrb[12].mxu0 %vm588_vm7, %v1201_v46  ;;  %1345 = vmatprep.subr.bf16.mxu1 %v1410_v49  ;;  %v1806_v52 = vld [vmem:[%s1934_s4] ss:$0 sm:$0xff] }
  0xc1   : > { %v1202_v27 = vcombine.low %v515_v24, %v516_v23  ;;  %v1246_v28 = vpack.c.bf16 %v1173_v26, %v1173_v26  ;;  %1315 = vmatpush3.bf16.msra.mxu0 %v1409_v47 }
  0xc2   : > { %1316 = vmatprep.subr.bf16.mxu0 %v1410_v49 }
  0xc3   : > { %v517_v29 = vadd.bf16 %v1246_v28, %v267_v25  ;;  %1298 = vmatprep.mubr.msk.bf16.mxu0 %vm588_vm7, %v1202_v27  ;;  %1353 = vmatpush3.bf16.msra.mxu1 %v1410_v49 }
  0xc5   : > { %v1203_v30 = vcombine.low %v517_v29, %v517_v29  ;;  %1317 = vmatpush3.bf16.msra.mxu0 %v1410_v49 }
  0xc8   : > { %1299 = vmatmul.mubr.msk.bf16.gmra.mrb[16].mxu0 %vm588_vm7, %v1203_v30 }
 0x17b   : > { %v1284_v31 = vpop.f32.mrb[0].mxu0 }
 0x17c   : > { %v666_v32 = vadd.f32 %v1284_v31, %v1806_v52  ;;  %v657_v33 = vpop.f32.mrb[1].mxu0 }
 0x17d   : > { %v658_v34 = vadd.f32 %v1806_v52, %v657_v33  ;;  %v1285_v35 = vpop.f32.mrb[2].mxu0 }
 0x17e   : > { %v669_v36 = vadd.f32 %v1285_v35, %v1806_v52  ;;  %v660_v37 = vpop.f32.mrb[3].mxu0  ;;  %v737_v39 = vmax.f32 %v666_v32, 0.0 }
 0x17f   : > { %v661_v38 = vadd.f32 %v1806_v52, %v660_v37  ;;  %v735_v41 = vmax.f32 %v658_v34, 0.0 }
 0x180   : > { %v738_v40 = vmax.f32 %v669_v36, 0.0  ;;  %v1830_v36 = vld [vmem:[%s1934_s4 + $0x1] ss:$0 sm:$0xff] }
 0x181   : > { %v736_v42 = vmax.f32 %v661_v38, 0.0 }
 0x182   : > { %v755_v48 = vpack.c.bf16 %v738_v40, %v737_v39 }
 0x183   : > { %v754_v50 = vpack.c.bf16 %v736_v42, %v735_v41  ;;  %v1288_v51 = vpop.f32.mrb[4].mxu0 }
 0x184   : > { %v682_v53 = vadd.f32 %v1288_v51, %v1806_v52  ;;  %v673_v43 = vpop.f32.mrb[5].mxu0 }
 0x185   : > { %v674_v54 = vadd.f32 %v1806_v52, %v673_v43  ;;  %v1289_v55 = vpop.f32.mrb[6].mxu0  ;;  %1318 = vmatprep.mubr.bf16.mxu0 %v754_v50 }
 0x186   : > { %v685_v56 = vadd.f32 %v1289_v55, %v1806_v52  ;;  %v676_v57 = vpop.f32.mrb[7].mxu0  ;;  %1319 = vmatmul.mubr.bf16.vlgmr.msra.gmra.mrb[20].mxu0 %v755_v48  ;;  %v741_v59 = vmax.f32 %v682_v53, 0.0 }
 0x187   : > { %v677_v58 = vadd.f32 %v1806_v52, %v676_v57  ;;  %v739_v61 = vmax.f32 %v674_v54, 0.0 }
 0x188   : > { %v742_v60 = vmax.f32 %v685_v56, 0.0 }
 0x189   : > { %v740_v62 = vmax.f32 %v677_v58, 0.0 }
 0x18a   : > { %v757_v44 = vpack.c.bf16 %v742_v60, %v741_v59 }
 0x18b   : > { %v1292_v63 = vpop.f32.mrb[8].mxu0  ;;  %v756_v0 = vpack.c.bf16 %v740_v62, %v739_v61 }
 0x18c   : > { %v698_v1 = vadd.f32 %v1292_v63, %v1806_v52  ;;  %v689_v2 = vpop.f32.mrb[9].mxu0 }
 0x18d   : > { %v690_v3 = vadd.f32 %v1806_v52, %v689_v2  ;;  %v1293_v4 = vpop.f32.mrb[10].mxu0  ;;  %1322 = vmatprep.mubr.bf16.mxu1 %v756_v0 }
 0x18e   : > { %v701_v5 = vadd.f32 %v1293_v4, %v1806_v52  ;;  %v692_v6 = vpop.f32.mrb[11].mxu0  ;;  %1323 = vmatmul.mubr.bf16.vlgmr.msra.gmra.mrb[0].mxu1 %v757_v44  ;;  %v745_v8 = vmax.f32 %v698_v1, 0.0 }
 0x18f   : > { %v693_v7 = vadd.f32 %v1806_v52, %v692_v6  ;;  %v743_v45 = vmax.f32 %v690_v3, 0.0 }
 0x190   : > { %v746_v9 = vmax.f32 %v701_v5, 0.0 }
 0x191   : > { %v744_v10 = vmax.f32 %v693_v7, 0.0 }
 0x192   : > { %v759_v11 = vpack.c.bf16 %v746_v9, %v745_v8 }
 0x193   : > { %v758_v12 = vpack.c.bf16 %v744_v10, %v743_v45  ;;  %v1296_v13 = vpop.f32.mrb[12].mxu0 }
 0x194   : > { %v714_v14 = vadd.f32 %v1296_v13, %v1806_v52  ;;  %v705_v15 = vpop.f32.mrb[13].mxu0 }
 0x195   : > { %v706_v16 = vadd.f32 %v1806_v52, %v705_v15  ;;  %v1297_v17 = vpop.f32.mrb[14].mxu0  ;;  %1326 = vmatprep.mubr.bf16.mxu1 %v758_v12 }
 0x196   : > { %v717_v18 = vadd.f32 %v1297_v17, %v1806_v52  ;;  %v708_v19 = vpop.f32.mrb[15].mxu0  ;;  %1327 = vmatmul.mubr.bf16.gmra.mrb[4].mxu1 %v759_v11  ;;  %v749_v20 = vmax.f32 %v714_v14, 0.0 }
 0x197   : > { %v709_v46 = vadd.f32 %v1806_v52, %v708_v19  ;;  %v747_v22 = vmax.f32 %v706_v16, 0.0 }
 0x198   : > { %v750_v21 = vmax.f32 %v717_v18, 0.0 }
 0x199   : > { %v748_v23 = vmax.f32 %v709_v46, 0.0 }
 0x19a   : > { %v761_v24 = vpack.c.bf16 %v750_v21, %v749_v20 }
 0x19b   : > { %v760_v25 = vpack.c.bf16 %v748_v23, %v747_v22  ;;  %v1300_v26 = vpop.f32.mrb[16].mxu0 }
 0x19c   : > { %v730_v27 = vadd.f32 %v1300_v26, %v1806_v52  ;;  %v721_v28 = vpop.f32.mrb[17].mxu0 }
 0x19d   : > { %v722_v29 = vadd.f32 %v1806_v52, %v721_v28  ;;  %v1301_v30 = vpop.f32.mrb[18].mxu0  ;;  %1330 = vmatprep.mubr.bf16.mxu1 %v760_v25 }
 0x19e   : > { %v724_v47 = vpop.f32.mrb[19].mxu0  ;;  %1331 = vmatmul.mubr.bf16.gmra.mrb[8].mxu1 %v761_v24  ;;  %v753_v31 = vmax.f32 %v730_v27, 0.0 }
 0x19f   : > { %v725_v49 = vadd.f32 %v1806_v52, %v724_v47  ;;  %v751_v32 = vmax.f32 %v722_v29, 0.0 }
 0x1a0   : > { %v763_v35 = vpack.c.bf16 %v753_v31, %v753_v31 }
 0x1a1   : > { %v752_v33 = vmax.f32 %v725_v49, 0.0 }
 0x1a3   : > { %v762_v34 = vpack.c.bf16 %v752_v33, %v751_v32 }
 0x1a5   : > { %1334 = vmatprep.mubr.bf16.mxu1 %v762_v34 }
 0x1a6   : > { %1335 = vmatmul.mubr.bf16.gmra.mrb[12].mxu1 %v763_v35 }
 0x259   : > { %v1320_v37 = vpop.f32.mrb[20].mxu0 }
 0x25a   : > { %v878_v38 = vadd.f32 %v1320_v37, %v1830_v36  ;;  %v869_v39 = vpop.f32.mrb[21].mxu0 }
 0x25b   : > { %v870_v40 = vadd.f32 %v1830_v36, %v869_v39  ;;  %v1321_v41 = vpop.f32.mrb[22].mxu0 }
 0x25c   : > { %v949_v52 = vsub.f32 0.0, %v878_v38  ;;  %v881_v42 = vadd.f32 %v1321_v41, %v1830_v36  ;;  %v872_v48 = vpop.f32.mrb[23].mxu0 }
 0x25d   : > { %v947_v50 = vsub.f32 0.0, %v870_v40  ;;  %v873_v51 = vadd.f32 %v1830_v36, %v872_v48 }
 0x25e   : > { %v970_v53 = vmul.f32 1.442695, %v949_v52  ;;  %v950_v43 = vsub.f32 0.0, %v881_v42 }
 0x25f   : > { %v966_v54 = vmul.f32 1.442695, %v947_v50  ;;  %v948_v55 = vsub.f32 0.0, %v873_v51 }
 0x260   : > { %1411 = vpow2.f32 %v970_v53  ;;  %v972_v56 = vmul.f32 1.442695, %v950_v43 }
 0x261   : > { %1413 = vpow2.f32 %v966_v54  ;;  %v968_v57 = vmul.f32 1.442695, %v948_v55  ;;  %v1324_v58 = vpop.f32.mrb[0].mxu1 }
 0x262   : > { %1415 = vpow2.f32 %v972_v56  ;;  %v894_v59 = vadd.f32 %v1324_v58, %v1830_v36  ;;  %v885_v60 = vpop.f32.mrb[1].mxu1 }
 0x263   : > { %1417 = vpow2.f32 %v968_v57  ;;  %v886_v61 = vadd.f32 %v1830_v36, %v885_v60  ;;  %v1325_v62 = vpop.f32.mrb[2].mxu1 }
 0x264   : > { %v953_v44 = vsub.f32 0.0, %v894_v59  ;;  %v897_v63 = vadd.f32 %v1325_v62, %v1830_v36  ;;  %v888_v0 = vpop.f32.mrb[3].mxu1 }
 0x265   : > { %v951_v1 = vsub.f32 0.0, %v886_v61  ;;  %v889_v2 = vadd.f32 %v1830_v36, %v888_v0 }
 0x266   : > { %v978_v3 = vmul.f32 1.442695, %v953_v44  ;;  %v954_v4 = vsub.f32 0.0, %v897_v63 }
 0x267   : > { %v974_v5 = vmul.f32 1.442695, %v951_v1  ;;  %v952_v6 = vsub.f32 0.0, %v889_v2 }
 0x268   : > { %1419 = vpow2.f32 %v978_v3  ;;  %v980_v7 = vmul.f32 1.442695, %v954_v4 }
 0x269   : > { %1421 = vpow2.f32 %v974_v5  ;;  %v976_v8 = vmul.f32 1.442695, %v952_v6  ;;  %v1328_v9 = vpop.f32.mrb[4].mxu1 }
 0x26a   : > { %v1412_v45 = vpop.eup %1411  ;;  %1423 = vpow2.f32 %v980_v7  ;;  %v910_v10 = vadd.f32 %v1328_v9, %v1830_v36  ;;  %v901_v11 = vpop.f32.mrb[5].mxu1 }
 0x26b   : > { %v1414_v12 = vpop.eup %1413  ;;  %v1006_v13 = vadd.f32 1.0, %v1412_v45  ;;  %1425 = vpow2.f32 %v976_v8  ;;  %v902_v14 = vadd.f32 %v1830_v36, %v901_v11  ;;  %v1329_v15 = vpop.f32.mrb[6].mxu1 }
 0x26c   : > { %v1416_v16 = vpop.eup %1415  ;;  %v1004_v17 = vadd.f32 1.0, %v1414_v12  ;;  %v957_v18 = vsub.f32 0.0, %v910_v10  ;;  %v913_v19 = vadd.f32 %v1329_v15, %v1830_v36  ;;  %v904_v46 = vpop.f32.mrb[7].mxu1 }
 0x26d   : > { %v1418_v20 = vpop.eup %1417  ;;  %1427 = vrcp.f32 %v1006_v13  ;;  %v1007_v21 = vadd.f32 1.0, %v1416_v16  ;;  %v955_v22 = vsub.f32 0.0, %v902_v14  ;;  %v905_v23 = vadd.f32 %v1830_v36, %v904_v46 }
 0x26e   : > { %1429 = vrcp.f32 %v1004_v17  ;;  %v1005_v24 = vadd.f32 1.0, %v1418_v20  ;;  %v986_v25 = vmul.f32 1.442695, %v957_v18  ;;  %v958_v26 = vsub.f32 0.0, %v913_v19 }
 0x26f   : > { %1431 = vrcp.f32 %v1007_v21  ;;  %v982_v27 = vmul.f32 1.442695, %v955_v22  ;;  %v956_v28 = vsub.f32 0.0, %v905_v23 }
 0x270   : > { %1433 = vrcp.f32 %v1005_v24  ;;  %v988_v29 = vmul.f32 1.442695, %v958_v26 }
 0x271   : > { %1435 = vpow2.f32 %v986_v25  ;;  %v984_v30 = vmul.f32 1.442695, %v956_v28  ;;  %v1332_v47 = vpop.f32.mrb[8].mxu1 }
 0x272   : > { %v1420_v49 = vpop.eup %1419  ;;  %1437 = vpow2.f32 %v982_v27  ;;  %v926_v31 = vadd.f32 %v1332_v47, %v1830_v36  ;;  %v917_v32 = vpop.f32.mrb[9].mxu1 }
 0x273   : > { %v1422_v33 = vpop.eup %1421  ;;  %v1010_v34 = vadd.f32 1.0, %v1420_v49  ;;  %1439 = vpow2.f32 %v988_v29  ;;  %v918_v35 = vadd.f32 %v1830_v36, %v917_v32  ;;  %v1333_v37 = vpop.f32.mrb[10].mxu1 }
 0x274   : > { %v1424_v38 = vpop.eup %1423  ;;  %v1008_v39 = vadd.f32 1.0, %v1422_v33  ;;  %1441 = vpow2.f32 %v984_v30  ;;  %v961_v40 = vsub.f32 0.0, %v926_v31  ;;  %v929_v41 = vadd.f32 %v1333_v37, %v1830_v36  ;;  %v920_v52 = vpop.f32.mrb[11].mxu1 }
 0x275   : > { %v1426_v42 = vpop.eup %1425  ;;  %1443 = vrcp.f32 %v1010_v34  ;;  %v1011_v48 = vadd.f32 1.0, %v1424_v38  ;;  %v959_v50 = vsub.f32 0.0, %v918_v35  ;;  %v921_v51 = vadd.f32 %v1830_v36, %v920_v52 }
 0x276   : > { %1445 = vrcp.f32 %v1008_v39  ;;  %v1009_v53 = vadd.f32 1.0, %v1426_v42  ;;  %v994_v43 = vmul.f32 1.442695, %v961_v40  ;;  %v962_v54 = vsub.f32 0.0, %v929_v41 }
 0x277   : > { %v1428_v55 = vpop.eup %1427  ;;  %1447 = vrcp.f32 %v1011_v48  ;;  %v990_v56 = vmul.f32 1.442695, %v959_v50  ;;  %v960_v57 = vsub.f32 0.0, %v921_v51 }
 0x278   : > { %v1430_v58 = vpop.eup %1429  ;;  %1044 = vst [vmem:[%s1854_s9 + $0x10] sm:$0xff] %v1428_v55  ;;  %1449 = vrcp.f32 %v1009_v53  ;;  %v996_v59 = vmul.f32 1.442695, %v962_v54 }
 0x279   : > { %v1432_v60 = vpop.eup %1431  ;;  %1042 = vst [vmem:[%s1854_s9] sm:$0xff] %v1430_v58  ;;  %1451 = vpow2.f32 %v994_v43  ;;  %v992_v61 = vmul.f32 1.442695, %v960_v57  ;;  %v1336_v62 = vpop.f32.mrb[12].mxu1 }
 0x27a   : > { %v1434_v44 = vpop.eup %1433  ;;  %1045 = vst [vmem:[%s1854_s9 + $0x18] sm:$0xff] %v1432_v60  ;;  %1453 = vpow2.f32 %v990_v56  ;;  %v942_v63 = vadd.f32 %v1336_v62, %v1830_v36  ;;  %v933_v0 = vpop.f32.mrb[13].mxu1 }
 0x27b   : > { %v1436_v1 = vpop.eup %1435  ;;  %1043 = vst [vmem:[%s1854_s9 + $0x8] sm:$0xff] %v1434_v44  ;;  %1455 = vpow2.f32 %v996_v59  ;;  %v934_v2 = vadd.f32 %v1830_v36, %v933_v0  ;;  %v1337_v3 = vpop.f32.mrb[14].mxu1 }
 0x27c   : > { %v1438_v4 = vpop.eup %1437  ;;  %v1014_v5 = vadd.f32 1.0, %v1436_v1  ;;  %1457 = vpow2.f32 %v992_v61  ;;  %v965_v6 = vsub.f32 0.0, %v942_v63  ;;  %v936_v7 = vpop.f32.mrb[15].mxu1 }
 0x27d   : > { %v1440_v8 = vpop.eup %1439  ;;  %v1012_v9 = vadd.f32 1.0, %v1438_v4  ;;  %v963_v45 = vsub.f32 0.0, %v934_v2  ;;  %v937_v10 = vadd.f32 %v1830_v36, %v936_v7 }
 0x27e   : > { %v1442_v11 = vpop.eup %1441  ;;  %1459 = vrcp.f32 %v1014_v5  ;;  %v1015_v12 = vadd.f32 1.0, %v1440_v8  ;;  %v1002_v13 = vmul.f32 1.442695, %v965_v6 }
 0x27f   : > { %v1444_v14 = vpop.eup %1443  ;;  %1461 = vrcp.f32 %v1012_v9  ;;  %v1013_v15 = vadd.f32 1.0, %v1442_v11  ;;  %v998_v16 = vmul.f32 1.442695, %v963_v45  ;;  %v964_v17 = vsub.f32 0.0, %v937_v10 }
 0x280   : > { %v1446_v18 = vpop.eup %1445  ;;  %1048 = vst [vmem:[%s1854_s9 + $0x30] sm:$0xff] %v1444_v14  ;;  %1463 = vrcp.f32 %v1015_v12 }
 0x281   : > { %v1448_v19 = vpop.eup %1447  ;;  %1046 = vst [vmem:[%s1854_s9 + $0x20] sm:$0xff] %v1446_v18  ;;  %1465 = vrcp.f32 %v1013_v15  ;;  %v1000_v46 = vmul.f32 1.442695, %v964_v17 }
 0x282   : > { %v1450_v20 = vpop.eup %1449  ;;  %1049 = vst [vmem:[%s1854_s9 + $0x38] sm:$0xff] %v1448_v19  ;;  %1467 = vpow2.f32 %v1002_v13 }
 0x283   : > { %v1452_v36 = vpop.eup %1451  ;;  %1047 = vst [vmem:[%s1854_s9 + $0x28] sm:$0xff] %v1450_v20  ;;  %1469 = vpow2.f32 %v998_v16 }
 0x284   : > { %v1454_v21 = vpop.eup %1453  ;;  %v1018_v22 = vadd.f32 1.0, %v1452_v36  ;;  %1471 = vpow2.f32 %v1000_v46 }
 0x285   : > { %v1456_v23 = vpop.eup %1455  ;;  %v1016_v24 = vadd.f32 1.0, %v1454_v21 }
 0x286   : > { %v1458_v25 = vpop.eup %1457  ;;  %1473 = vrcp.f32 %v1018_v22  ;;  %v1019_v26 = vadd.f32 1.0, %v1456_v23 }
 0x287   : > { %1475 = vrcp.f32 %v1016_v24  ;;  %v1017_v27 = vadd.f32 1.0, %v1458_v25 }
 0x288   : > { %v1460_v28 = vpop.eup %1459  ;;  %1477 = vrcp.f32 %v1019_v26 }
 0x289   : > { %v1462_v29 = vpop.eup %1461  ;;  %1052 = vst [vmem:[%s1854_s9 + $0x50] sm:$0xff] %v1460_v28  ;;  %1479 = vrcp.f32 %v1017_v27 }
 0x28a   : > { %v1464_v30 = vpop.eup %1463  ;;  %1050 = vst [vmem:[%s1854_s9 + $0x40] sm:$0xff] %v1462_v29 }
 0x28b   : > { %v1466_v47 = vpop.eup %1465  ;;  %1053 = vst [vmem:[%s1854_s9 + $0x58] sm:$0xff] %v1464_v30 }
 0x28c   : > { %v1468_v49 = vpop.eup %1467  ;;  %1051 = vst [vmem:[%s1854_s9 + $0x48] sm:$0xff] %v1466_v47 }
 0x28d   : > { %v1470_v31 = vpop.eup %1469  ;;  %v1022_v32 = vadd.f32 1.0, %v1468_v49 }
 0x28e   : > { %v1472_v33 = vpop.eup %1471  ;;  %v1020_v34 = vadd.f32 1.0, %v1470_v31 }
 0x28f   : > { %1481 = vrcp.f32 %v1022_v32  ;;  %v1021_v35 = vadd.f32 1.0, %v1472_v33 }
 0x290   : > { %v1474_v37 = vpop.eup %1473  ;;  %1483 = vrcp.f32 %v1020_v34 }
 0x291   : > { %v1476_v38 = vpop.eup %1475  ;;  %1056 = vst [vmem:[%s1854_s9 + $0x70] sm:$0xff] %v1474_v37  ;;  %1485 = vrcp.f32 %v1021_v35 }
 0x292   : > { %v1478_v39 = vpop.eup %1477  ;;  %1054 = vst [vmem:[%s1854_s9 + $0x60] sm:$0xff] %v1476_v38 }
 0x293   : > { %v1480_v40 = vpop.eup %1479  ;;  %1057 = vst [vmem:[%s1854_s9 + $0x78] sm:$0xff] %v1478_v39 }
 0x294   : > { %1055 = vst [vmem:[%s1854_s9 + $0x68] sm:$0xff] %v1480_v40 }
 0x299   : > { %v1482_v41 = vpop.eup %1481 }
 0x29a   : > { %v1484_v52 = vpop.eup %1483  ;;  %1060 = vst [vmem:[%s1854_s9 + $0x90] sm:$0xff] %v1482_v41 }
 0x29b   : > { %v1486_v42 = vpop.eup %1485  ;;  %1058 = vst [vmem:[%s1854_s9 + $0x80] sm:$0xff] %v1484_v52 }
 0x29c   : > { %1059 = vst [vmem:[%s1854_s9 + $0x88] sm:$0xff] %v1486_v42 }
 0x29d   : > { %1500 = shalt.err (!%p1497_p3)
}
 0x29e   : > { %s1501_s23 = scalar_lea.hbm %s1880_s14, 2432  ;;  %s1505_s6 = scalar_lea.hbm %s1935_s5, 4864 }
 0x29f   : > { %p1502_p4 = scmp.ne.s32.totalorder %s1880_s14, %s1501_s23  ;;  %p1506_p9 = scmp.lt.u32.totalorder %s1880_s14, %s1935_s5 }
 0x2a0   : > { %p1507_p10 = scmp.lt.u32.totalorder %s1505_s6, %s1501_s23  ;;  %p1509_p12 = scmp.lt.u32.totalorder %s1501_s23, %s1880_s14 }
 0x2a1   : > { %p1503_p7 = pnand %p1502_p4, %p1624_p5 }
 0x2a2   : > { %p1508_p11 = por %p1507_p10, %p1506_p9 }
 0x2a3   : > { %p1504_p8 = pneg %p1503_p7 }
 0x2a4   : > { %p1510_p13 = por %p1509_p12, %p1508_p11 }
 0x2a6   : > { %p1511_p0 = pnand %p1510_p13, %p1504_p8 }
 0x2a8   : > { %1514 = shalt.err (!%p1511_p0)
}
 0x2a9   : > { %s1554_s9 = smov 128   ;;  %s1555_s10 = smov 8  }
 0x2aa   : > { %1356 = dma.vmem_to_hbm [thread:$0]  (%p1624_p5), %s1883_s11, 2432, %s1880_s14, %s1889_s30, %s1554_s9, %s1554_s9, %s1555_s10  }
 0x2ab PF: > { %p1362_p1 = scmp.ge.s32.totalorder %s1549_s21, 2  ;;  %s1090_s12 = sand.u32 1, %s1537_s18  }
 0x2ac   : > { %s1091_s13 = scalar_lea.sflag [#allocation3], %s1090_s12 }
 0x2ad   : > { %p1359_p2 = pnand %p1362_p1, %p1628_p6 }
 0x2af   : > { %1532 = dma.done.wait (!%p1359_p2), %s1091_s13, 2432  }
 0x2b0   : > { %1534 = vsyncadd (!%p1359_p2), %s1091_s13, 4294964864  ;;  %p15_p3 = scmp.ge.s32.totalorder %s1611_s24, 4   ;;  %s1938_s18 = smov %s1541_s19 }
 0x2b1   : > { %s1939_s19 = smov %s1545_s20  ;;  %s1940_s20 = smov %s1622_s27 }
 0x2b2   : > { %s1941_s21 = smov %s1611_s24  ;;  %17 = sbr.rel (!%p15_p3) target bundleno = 3 (0x3), region = 78 }
 0x2b9   :  { %1096 = vsyncpa [#allocation3], 1 }
 0x2ba   :  { %1098 = vsyncpa [#allocation3 + $0x1], 1 }

</bundles_post_ra>
